<compile_context>
chip_gen: v7x
topology: tpu7x:2x2x1
jax: 0.10.0
libtpu: 0.0.40
codegen_flags: <defaults>
</compile_context>

<pallas_src>
import functools
import math

import jax
import jax.numpy as jnp
from jax.experimental import pallas as pl
from jax.experimental.pallas import tpu as pltpu


def _round_up(x: int, m: int) -> int:
    return ((x + m - 1) // m) * m


def _cdiv(a: int, b: int) -> int:
    return (a + b - 1) // b


_TARGET_BLOCK_BYTES = 4 << 20   # ~4 MiB output blocks; v6e can sweep 8-16 MiB
_MAX_PACKED_WIDTH = 2048        # lanes; wider than this -> row-wise fallback


# ---------------------------------------------------------------------------
# Kernels
# ---------------------------------------------------------------------------

def _packed_kernel(tau_ref, w_ref, b_ref, o_ref, *, out_features, group):
    """Lane-dense path.

    tau_ref: (TM, G)    G consecutive logical rows packed per output row
    w_ref:   (G, W)     block-diagonal weights: w[k, j*F + c] = (k==j)*w_c
    b_ref:   (1, W)     bias tiled G times
    o_ref:   (TM, W)    row-major view of (TM*G, F), W = G*F (multiple of 128)
    """
    t = tau_ref[...]                                    # (TM, G) f32
    if group == 1:
        # F is a multiple of 128: plain per-row broadcast FMA on the VPU.
        z = t * w_ref[...] + b_ref[...]
    else:
        # Block-diagonal affine map on the (otherwise idle) MXU; fp32
        # contraction so the result matches the f32 PyTorch Linear.
        z = jnp.dot(t, w_ref[...],
                    preferred_element_type=jnp.float32,
                    precision=jax.lax.Precision.HIGHEST) + b_ref[...]

    # Hoisted single-row mask; the select broadcasts it over the tile rows.
    lane = jax.lax.broadcasted_iota(jnp.int32, (1, z.shape[-1]), 1)
    is_linear = (lane % out_features) == (out_features - 1)
    o_ref[...] = jnp.where(is_linear, z, jnp.cos(z)).astype(o_ref.dtype)


def _rowwise_kernel(tau_ref, w_ref, b_ref, o_ref, *, out_features):
    """Fallback for very wide / awkward F (packed width would exceed VMEM sanity).

    tau_ref: (TM, 1);  w_ref, b_ref: (1, F);  o_ref: (TM, F)
    """
    z = tau_ref[...] * w_ref[...] + b_ref[...]          # VPU broadcast FMA
    col = jax.lax.broadcasted_iota(jnp.int32, (1, out_features), 1)
    is_linear = col == (out_features - 1)
    o_ref[...] = jnp.where(is_linear, z, jnp.cos(z)).astype(o_ref.dtype)


# ---------------------------------------------------------------------------
# Wrapper
# ---------------------------------------------------------------------------

def cosine_activation(tau, w_weight, w_bias, w0_weight, w0_bias,
                      out_dtype=jnp.float32):
    """tau: (..., 1) float32.
    w_weight: (out_features-1, 1), w_bias: (out_features-1,)   [PyTorch Linear layout]
    w0_weight: (1, 1),             w0_bias: (1,)
    Returns (..., out_features) in out_dtype (default f32, matching PyTorch)."""
    in_features = tau.shape[-1]
    assert in_features == 1, "w0 is Linear(1,1) -> module requires in_features == 1"
    f = w_weight.shape[0] + 1                           # out_features

    lead = tau.shape[:-1]
    m = 1
    for d in lead:
        m *= d

    tau2d = tau.reshape(m, 1).astype(jnp.float32)
    # Combined per-output-column weight/bias (PyTorch Linear: x @ W.T + b).
    w_flat = jnp.concatenate([w_weight[:, 0], w0_weight[:, 0]], axis=0).astype(jnp.float32)
    b_flat = jnp.concatenate([w_bias, w0_bias], axis=0).astype(jnp.float32)

    out_itemsize = jnp.dtype(out_dtype).itemsize
    cost = pl.CostEstimate(
        flops=2 * m * f,
        transcendentals=m * f,
        bytes_accessed=m * f * out_itemsize + 4 * (m + 2 * f),
    )

    g = 128 // math.gcd(f, 128)                         # logical rows per packed row
    wp = g * f                                          # packed lane-dense width

    if wp <= _MAX_PACKED_WIDTH:
        # ---------------- lane-dense packed path ---------------------------
        mp = _cdiv(m, g)                                # packed rows actually needed
        mp8 = _round_up(mp, 8)                          # sublane-aligned output rows

        # Tile height: ~4 MiB output blocks; keep >= 2 grid steps for megacore.
        tmp_rows = max(8, (_TARGET_BLOCK_BYTES // (wp * out_itemsize)) // 8 * 8)
        tmp_rows = max(8, min(tmp_rows, _round_up(_cdiv(mp8, 2), 8)))
        grid_steps = _cdiv(mp8, tmp_rows)
        mp_in = grid_steps * tmp_rows                   # input padded to full tiles
        m_in = mp_in * g

        tau_p = jnp.pad(tau2d, ((0, m_in - m), (0, 0))) if m_in != m else tau2d
        tau_packed = tau_p.reshape(mp_in, g)            # free row-major regroup

        # Block-diagonal packed weights: w_pack[k, j*f + c] = (k == j) * w_flat[c]
        eye_g = jnp.eye(g, dtype=jnp.float32)
        w_pack = (eye_g[:, :, None] * w_flat[None, None, :]).reshape(g, wp)
        b_pack = jnp.tile(b_flat, g)[None, :]           # (1, wp)

        # VMEM budget: tau tile is lane-padded to 128 lanes; all double-buffered.
        vmem_needed = 2 * (tmp_rows * 128 * 4
                           + tmp_rows * wp * out_itemsize
                           + _round_up(g, 8) * wp * 4
                           + 8 * wp * 4)
        vmem_limit = min(max(int(1.25 * vmem_needed) + (2 << 20), 24 << 20), 56 << 20)

        kernel = functools.partial(_packed_kernel, out_features=f, group=g)
        out_packed = pl.pallas_call(
            kernel,
            out_shape=jax.ShapeDtypeStruct((mp8, wp), out_dtype),
            grid=(grid_steps,),
            in_specs=[
                pl.BlockSpec((tmp_rows, g), lambda i: (i, 0)),
                pl.BlockSpec((g, wp), lambda i: (0, 0)),
                pl.BlockSpec((1, wp), lambda i: (0, 0)),
            ],
            out_specs=pl.BlockSpec((tmp_rows, wp), lambda i: (i, 0)),
            compiler_params=pltpu.CompilerParams(
                dimension_semantics=("parallel",),
                vmem_limit_bytes=vmem_limit),
            cost_estimate=cost,
        )(tau_packed, w_pack, b_pack)

        out2d = out_packed.reshape(mp8 * g, f)          # contiguous reshape, no copy
        if mp8 * g != m:
            out2d = out2d[:m]                           # only the <8*g row remainder
    else:
        # ---------------- row-wise fallback (very wide F) -------------------
        fp = _round_up(f, 128)                          # lane-padded width in VMEM
        m8 = _round_up(m, 8)
        tm = max(8, (_TARGET_BLOCK_BYTES // (fp * out_itemsize)) // 8 * 8)
        tm = max(8, min(tm, _round_up(_cdiv(m8, 2), 8)))
        grid_steps = _cdiv(m8, tm)
        m_in = grid_steps * tm
        tau_p = jnp.pad(tau2d, ((0, m_in - m), (0, 0))) if m_in != m else tau2d

        vmem_needed = 2 * (tm * 128 * 4 + tm * fp * out_itemsize + 2 * 8 * fp * 4)
        vmem_limit = min(max(int(1.25 * vmem_needed) + (2 << 20), 24 << 20), 56 << 20)

        kernel = functools.partial(_rowwise_kernel, out_features=f)
        out2d = pl.pallas_call(
            kernel,
            out_shape=jax.ShapeDtypeStruct((m8, f), out_dtype),
            grid=(grid_steps,),
            in_specs=[
                pl.BlockSpec((tm, 1), lambda i: (i, 0)),
                pl.BlockSpec((1, f), lambda i: (0, 0)),
                pl.BlockSpec((1, f), lambda i: (0, 0)),
            ],
            out_specs=pl.BlockSpec((tm, f), lambda i: (i, 0)),
            compiler_params=pltpu.CompilerParams(
                dimension_semantics=("parallel",),
                vmem_limit_bytes=vmem_limit),
            cost_estimate=cost,
        )(tau_p, w_flat[None, :], b_flat[None, :])
        if m8 != m:
            out2d = out2d[:m]

    return out2d.reshape(*lead, f)


def _init_linear(key, out_f, in_f):
    # Deterministic init mimicking nn.Linear default: U(-1/sqrt(in), 1/sqrt(in))
    k_w, k_b = jax.random.split(key)
    bound = 1.0 / (in_f ** 0.5)
    w = jax.random.uniform(k_w, (out_f, in_f), jnp.float32, -bound, bound)
    b = jax.random.uniform(k_b, (out_f,), jnp.float32, -bound, bound)
    return w, b


if __name__ == "__main__":
    key = jax.random.PRNGKey(0)
    k_tau, k_w, k_w0 = jax.random.split(key, 3)

    batch, seq = 2, 8
    in_features, out_features = 1, 32

    tau = jax.random.normal(k_tau, (batch, seq, in_features), jnp.float32)
    w_weight, w_bias = _init_linear(k_w, out_features - 1, in_features)
    w0_weight, w0_bias = _init_linear(k_w0, 1, 1)

    def reference(t, w_w, w_b, w0_w, w0_b):
        # Pure elementwise f32 reference (Linear on a scalar input).
        v1 = jnp.cos(t * w_w[:, 0] + w_b)
        v2 = t * w0_w[0, 0] + w0_b
        return jnp.concatenate([v1, v2], axis=-1)

    # F = 32 divides 128 -> packed path, G = 4, width 128.
    out = jax.block_until_ready(
        cosine_activation(tau, w_weight, w_bias, w0_weight, w0_bias))
    ref = reference(tau, w_weight, w_bias, w0_weight, w0_bias)
    assert out.shape == (batch, seq, out_features)
    assert jnp.allclose(out, ref, atol=1e-5), "packed (divisor F) path mismatch"

    # F = 24 does not divide 128 -> generalized packing, G = 16, width 384.
    f2 = 24
    w_weight2, w_bias2 = _init_linear(k_w, f2 - 1, in_features)
    out2 = jax.block_until_ready(
        cosine_activation(tau, w_weight2, w_bias2, w0_weight, w0_bias))
    ref2 = reference(tau, w_weight2, w_bias2, w0_weight, w0_bias)
    assert out2.shape == (batch, seq, f2)
    assert jnp.allclose(out2, ref2, atol=1e-5), "packed (non-divisor F) path mismatch"

    # F = 200 -> packed width would be 3200 lanes, exercises the row-wise path.
    f3 = 200
    w_weight3, w_bias3 = _init_linear(k_w, f3 - 1, in_features)
    out3 = jax.block_until_ready(
        cosine_activation(tau, w_weight3, w_bias3, w0_weight, w0_bias))
    ref3 = reference(tau, w_weight3, w_bias3, w0_weight, w0_bias)
    assert out3.shape == (batch, seq, f3)
    assert jnp.allclose(out3, ref3, atol=1e-5), "row-wise fallback mismatch"

    print("KERNEL_OK")
</pallas_src>

<mosaic_0001>
module attributes {stable_mosaic.version = 11 : i64} {
  func.func @_packed_kernel(%arg0: i32, %arg1: memref<8x4xf32, #tpu.memory_space<vmem>>, %arg2: memref<4x128xf32, #tpu.memory_space<vmem>>, %arg3: memref<1x128xf32, #tpu.memory_space<vmem>>, %arg4: memref<8x128xf32, #tpu.memory_space<vmem>>) attributes {dimension_semantics = [#tpu.dimension_semantics<parallel>], iteration_bounds = array<i64: 1>, scalar_prefetch = 0 : i64, scratch_operands = 0 : i64, tpu.core_type = #tpu.core_type<tc>, window_params = [{transform_indices = @transform_0, window_bounds = array<i64: 8, 4>}, {pipeline_mode = #tpu.pipeline_mode<synchronous>, transform_indices = @transform_1, window_bounds = array<i64: 4, 128>}, {pipeline_mode = #tpu.pipeline_mode<synchronous>, transform_indices = @transform_2, window_bounds = array<i64: 1, 128>}, {transform_indices = @transform_3, window_bounds = array<i64: 8, 128>}]} {
    %c0 = arith.constant 0 : index
    %c0_0 = arith.constant 0 : index
    %0 = vector.load %arg1[%c0, %c0_0] : memref<8x4xf32, #tpu.memory_space<vmem>>, vector<8x4xf32>
    %c0_1 = arith.constant 0 : index
    %c0_2 = arith.constant 0 : index
    %1 = vector.load %arg2[%c0_1, %c0_2] : memref<4x128xf32, #tpu.memory_space<vmem>>, vector<4x128xf32>
    %cst = arith.constant dense<0.000000e+00> : vector<8x128xf32>
    %2 = tpu.matmul %0, %1, %cst {dimension_numbers = #tpu.dot_dimension_numbers<[1], [0], [0], [1], [0, 0, 1, 1], [], []>, precision = #tpu.contract_precision<fp32>} : vector<8x4xf32>, vector<4x128xf32>, vector<8x128xf32> -> vector<8x128xf32>
    %c0_3 = arith.constant 0 : index
    %c0_4 = arith.constant 0 : index
    %3 = vector.load %arg3[%c0_3, %c0_4] : memref<1x128xf32, #tpu.memory_space<vmem>>, vector<1x128xf32>
    %4 = vector.broadcast %3 : vector<1x128xf32> to vector<8x128xf32>
    %5 = arith.addf %2, %4 : vector<8x128xf32>
    %6 = tpu.iota {dimensions = array<i32: 1>} : vector<1x128xi32>
    %c32_i32 = arith.constant 32 : i32
    %c0_i32 = arith.constant 0 : i32
    %7 = arith.cmpi eq, %c32_i32, %c0_i32 : i32
    %c1_i32 = arith.constant 1 : i32
    %8 = arith.select %7, %c1_i32, %c32_i32 : i32
    %9 = vector.broadcast %8 : i32 to vector<1x128xi32>
    %10 = arith.remsi %6, %9 : vector<1x128xi32>
    %c0_i32_5 = arith.constant 0 : i32
    %11 = vector.broadcast %c0_i32_5 : i32 to vector<1x128xi32>
    %12 = arith.cmpi ne, %10, %11 : vector<1x128xi32>
    %c0_i32_6 = arith.constant 0 : i32
    %13 = vector.broadcast %c0_i32_6 : i32 to vector<1x128xi32>
    %14 = arith.cmpi slt, %10, %13 : vector<1x128xi32>
    %c0_i32_7 = arith.constant 0 : i32
    %15 = arith.cmpi slt, %8, %c0_i32_7 : i32
    %16 = vector.broadcast %15 : i1 to vector<1x128xi1>
    %17 = vector.broadcast %16 : vector<1x128xi1> to vector<1x128xi1>
    %18 = arith.xori %14, %17 : vector<1x128xi1>
    %19 = arith.andi %18, %12 : vector<1x128xi1>
    %20 = vector.broadcast %8 : i32 to vector<1x128xi32>
    %21 = arith.addi %10, %20 : vector<1x128xi32>
    %22 = arith.select %19, %21, %10 : vector<1x128xi1>, vector<1x128xi32>
    %c31_i32 = arith.constant 31 : i32
    %23 = vector.broadcast %c31_i32 : i32 to vector<1x128xi32>
    %24 = arith.cmpi eq, %22, %23 : vector<1x128xi32>
    %25 = math.cos %5 : vector<8x128xf32>
    %26 = vector.shape_cast %24 : vector<1x128xi1> to vector<1x128xi1>
    %27 = vector.broadcast %26 : vector<1x128xi1> to vector<8x128xi1>
    %28 = arith.select %27, %5, %25 : vector<8x128xi1>, vector<8x128xf32>
    %c0_8 = arith.constant 0 : index
    %c0_9 = arith.constant 0 : index
    %29 = vector.load %arg4[%c0_8, %c0_9] : memref<8x128xf32, #tpu.memory_space<vmem>>, vector<8x128xf32>
    tpu.vector_store %arg4[%c0_8, %c0_9], %28 {strides = array<i32>} : memref<8x128xf32, #tpu.memory_space<vmem>>, vector<8x128xf32>,
    return
  }
  func.func @transform_0(%arg0: i32) -> (i32, i32) {
    %c0_i32 = arith.constant 0 : i32
    %c0_i32_0 = arith.constant 0 : i32
    return %arg0, %c0_i32 : i32, i32
  }
  func.func @transform_1(%arg0: i32) -> (i32, i32) {
    %c0_i32 = arith.constant 0 : i32
    %c0_i32_0 = arith.constant 0 : i32
    %c0_i32_1 = arith.constant 0 : i32
    return %c0_i32, %c0_i32_0 : i32, i32
  }
  func.func @transform_2(%arg0: i32) -> (i32, i32) {
    %c0_i32 = arith.constant 0 : i32
    %c0_i32_0 = arith.constant 0 : i32
    %c0_i32_1 = arith.constant 0 : i32
    return %c0_i32, %c0_i32_0 : i32, i32
  }
  func.func @transform_3(%arg0: i32) -> (i32, i32) {
    %c0_i32 = arith.constant 0 : i32
    %c0_i32_0 = arith.constant 0 : i32
    return %arg0, %c0_i32 : i32, i32
  }
}

</mosaic_0001>

<bundles_post_ra>
// kernel: tpu_custom_call.1
= control target key start
LH: loop header
LB: loop body
LE: loop exit
PB: predicated region body
PF: predicated region fallthrough
CT: control target
= control target key end

     0   :  { %vm28_vm0 = vcmask 1043456   ;;  %v712_v2 = vmov 0.0   ;;  %vm713_vm1 = vmmov 0   ;;  %vm24_vm2 = vcmask 31744   ;;  %s790_s0 = inlined_call_operand.vmem [shape: f32[8,4], index: 0, kind: input, shape index: {}]   ;;  %s791_s1 = inlined_call_operand.vmem [shape: f32[4,128], index: 1, kind: input, shape index: {}]   ;;  %s792_s2 = inlined_call_operand.vmem [shape: f32[1,128], index: 2, kind: input, shape index: {}]   ;;  %s793_s3 = inlined_call_operand.hbm [shape: f32[8,128], index: 3, kind: output, shape index: {}]  }
   0x1   :  { %v16_v0 = vld [vmem:[%s791_s1] sm:$0xf]  ;;  %646 = vmatprep.subr.mxu0 %v712_v2  ;;  %648 = vmatprep.mubr.msk.f32.mxu0 %vm713_vm1, %v712_v2 }
   0x2   :  { %v15_v1 = vld [vmem:[%s790_s0] sm:$0xff]  ;;  %v30_v3 = vsel %vm28_vm0, %v16_v0, 0 }
   0x3   :  { %8 = vsyncpa [#allocation3], 0  ;;  %v33_v4 = vand.u32 4294901760, %v30_v3  ;;  %v26_v5 = vsel %vm24_vm2, %v15_v1, 0  ;;  %631 = vmatprep.subr.mxu1 %v712_v2  ;;  %633 = vmatprep.mubr.msk.f32.mxu1 %vm713_vm1, %v712_v2  ;;  %v614_v17 = vld [vmem:[%s792_s2] ss:$0 sm:$0xff] }
   0x4   :  { %v98_v6 = vand.u32 4294901760, %v26_v5  ;;  %v714_v32 = vmov 683565275   ;;  %v715_v34 = vmov 2475754826   ;;  %s720_s2 = smov [#allocation2]  }
   0x5   :  { %v110_v7 = vsub.f32 %v30_v3, %v33_v4  ;;  %647 = vmatpush3.msra.mxu0 %v33_v4  ;;  %632 = vmatpush3.msra.mxu1 %v33_v4  ;;  %v716_v37 = vmov 2131351028   ;;  %v717_v40 = vmov 2102212464   ;;  %v718_v43 = vmov 920167782  }
   0x6   :  { %v99_v8 = vsub.f32 %v26_v5, %v98_v6  ;;  %636 = vmatprep.subr.mxu1 %v712_v2  ;;  %651 = vmatprep.subr.mxu0 %v712_v2  ;;  %v719_v46 = vmov 1326507024   ;;  %s606_s16 = sshll.u32 %s720_s2, 4  ;;  %s607_s16 = int_to_ptr.vmem [resolvable:$true] %s606_s16 }
   0x7   :  { %v111_v9 = vand.u32 4294901760, %v110_v7  ;;  %s688_s17 = scalar_lea.vmem %s607_s16, 128  ;;  %p693_p1 = scmp.lt.s32.totalorder %s607_s16, %s607_s16 }
   0x8   :  { %v100_v10 = vand.u32 4294901760, %v99_v8  ;;  %p689_p0 = scmp.ne.s32.totalorder %s607_s16, %s688_s17  ;;  %p694_p2 = scmp.lt.s32.totalorder %s688_s17, %s688_s17 }
   0x9   :  { %v112_v11 = vsub.f32 %v110_v7, %v111_v9 }
   0xa   :  { %649 = vmatmul.mubr.f32.vlgmr.msra.gmra.mrb[0].mxu0 %v100_v10  ;;  %v101_v12 = vsub.f32 %v99_v8, %v100_v10  ;;  %p695_p3 = por %p694_p2, %p693_p1 }
   0xb   :  { %v113_v13 = vand.u32 4294901760, %v112_v11  ;;  %652 = vmatpush3.msra.mxu0 %v111_v9  ;;  %653 = vmatprep.mubr.msk.f32.mxu0 %vm713_vm1, %v712_v2 }
   0xc   :  { %v102_v14 = vand.u32 4294901760, %v101_v12  ;;  %656 = vmatprep.subr.mxu0 %v712_v2  ;;  %p696_p4 = pnand %p695_p3, %p689_p0 }
   0xe   :  { %634 = vmatmul.mubr.f32.vlgmr.msra.gmra.mrb[0].mxu1 %v102_v14 }
   0xf   :  { %637 = vmatpush3.msra.mxu1 %v113_v13  ;;  %638 = vmatprep.mubr.msk.f32.mxu1 %vm713_vm1, %v712_v2 }
  0x10   :  { %641 = vmatprep.subr.mxu1 %v712_v2 }
  0x12   :  { %654 = vmatmul.mubr.f32.vlgmr.msra.gmra.mrb[0].mxu0 %v98_v6 }
  0x13   :  { %657 = vmatpush3.msra.mxu0 %v33_v4  ;;  %658 = vmatprep.mubr.msk.f32.mxu0 %vm713_vm1, %v712_v2 }
  0x16   :  { %639 = vmatmul.mubr.f32.vlgmr.msra.gmra.mrb[0].mxu1 %v98_v6 }
  0x17   :  { %642 = vmatpush3.msra.mxu1 %v110_v7  ;;  %643 = vmatprep.mubr.msk.f32.mxu1 %vm713_vm1, %v712_v2 }
  0x1a   :  { %659 = vmatmul.mubr.f32.vlgmr.msra.gmra.mrb[0].mxu0 %v98_v6 }
  0x1e   :  { %644 = vmatmul.mubr.f32.vlgmr.msra.gmra.mrb[0].mxu1 %v99_v8 }
  0xed   :  { %v474_v15 = vpop.f32.mrb[0].mxu0 }
  0xee   :  { %v660_v16 = vpop.f32.mrb[1].mxu0 }
  0xf1   :  { %v254_v18 = vpop.f32.mrb[0].mxu1 }
  0xf2   :  { %v661_v19 = vadd.f32 %v614_v17, %v254_v18  ;;  %v645_v20 = vpop.f32.mrb[1].mxu1 }
  0xf4   :  { %v756_v21 = vadd.f32 %v661_v19, %v474_v15 }
  0xf6   :  { %v496_v22 = vand.u32 2139095040, %v756_v21  ;;  %v493_v26 = vand.u32 2147483647, %v756_v21  ;;  %vm495_vm10 = vcmp.lt.s32.totalorder %v756_v21, 0  ;;  %vm585_vm0 = vweird.f32 %v756_v21 }
  0xf8   :  { %v497_v23 = vshrl.u32 %v496_v22, 23  ;;  %v500_v30 = vand.u32 8388607, %v493_v26  ;;  %vm494_vm11 = vcmp.le.f32.partialorder %v493_v26, 0.7853982 }
  0xfa   :  { %v615_v24 = vadd.s32 4294967169, %v497_v23  ;;  %v501_v48 = vor.u32 8388608, %v500_v30 }
  0xfc   :  { %v503_v25 = vadd.s32 1, %v615_v24  ;;  %v541_v62 = vshll.u32 %v501_v48, 8 }
  0xfe   :  { %vm504_vm3 = vcmp.gt.s32.totalorder %v503_v25, 0 }
  0xff   :  { %v505_v27 = vsel %vm504_vm3, %v503_v25, 0 }
 0x100   :  { %v507_v28 = vand.u32 31, %v505_v27  ;;  %v506_v31 = vshrl.u32 %v505_v27, 5 }
 0x102   :  { %v508_v29 = vsub.s32 32, %v507_v28  ;;  %v510_v33 = vshll.u32 %v714_v32, %v507_v28  ;;  %v513_v35 = vshll.u32 %v715_v34, %v507_v28  ;;  %v516_v39 = vshll.u32 %v716_v37, %v507_v28 }
 0x103   :  { %v519_v42 = vshll.u32 %v717_v40, %v507_v28  ;;  %v522_v45 = vshll.u32 %v718_v43, %v507_v28  ;;  %vm525_vm4 = vcmp.lt.s32.totalorder %v506_v31, 1  ;;  %vm528_vm5 = vcmp.lt.s32.totalorder %v506_v31, 4 }
 0x104   :  { %v511_v36 = vshrl.u32 %v715_v34, %v508_v29  ;;  %v514_v38 = vshrl.u32 %v716_v37, %v508_v29  ;;  %v517_v41 = vshrl.u32 %v717_v40, %v508_v29  ;;  %v520_v44 = vshrl.u32 %v718_v43, %v508_v29 }
 0x105   :  { %v523_v47 = vshrl.u32 %v719_v46, %v508_v29  ;;  %v509_v57 = vshrl.u32 %v714_v32, %v508_v29  ;;  %vm527_vm6 = vcmp.lt.s32.totalorder %v506_v31, 3  ;;  %vm526_vm7 = vcmp.lt.s32.totalorder %v506_v31, 2 }
 0x106   :  { %v512_v49 = vor.u32 %v511_v36, %v510_v33  ;;  %v515_v50 = vor.u32 %v514_v38, %v513_v35  ;;  %v518_v51 = vor.u32 %v517_v41, %v516_v39  ;;  %v521_v52 = vor.u32 %v520_v44, %v519_v42 }
 0x107   :  { %v524_v53 = vor.u32 %v523_v47, %v522_v45  ;;  %v478_v39 = vlaneseq }
 0x108   :  { %v530_v54 = vsel %vm528_vm5, %v518_v51, 2102212464  ;;  %v533_v55 = vsel %vm525_vm4, %v512_v49, %v515_v50  ;;  %v537_v56 = vsel %vm525_vm4, %v515_v50, %v518_v51  ;;  %v534_v58 = vsel %vm528_vm5, %v521_v52, 920167782 }
 0x109   :  { %v538_v59 = vsel %vm528_vm5, %v524_v53, 1326507024  ;;  %v535_v60 = vsel %vm527_vm6, %v518_v51, %v534_v58  ;;  %v529_v63 = vsel %vm525_vm4, %v509_v57, %v512_v49  ;;  %v531_v0 = vsel %vm527_vm6, %v515_v50, %v530_v54 }
 0x10a   :  { %v539_v61 = vsel %vm527_vm6, %v521_v52, %v538_v59  ;;  %v536_v1 = vsel %vm526_vm7, %v533_v55, %v535_v60  ;;  %v532_v7 = vsel %vm526_vm7, %v529_v63, %v531_v0  ;;  %v479_v42 = vand.u32 127, %v478_v39 }
 0x10b   :  { %v540_v2 = vsel %vm526_vm7, %v537_v56, %v539_v61  ;;  %v765_v5 = vmul.u32.u64.low %v541_v62, %v536_v1  ;;  %v766_v6 = vmul.u32.u64.high %v541_v62, %v536_v1, %v765_v5  ;;  %v548_v9 = vmul.u32 %v541_v62, %v532_v7 }
 0x10c   :  { %v762_v3 = vmul.u32.u64.low %v541_v62, %v540_v2  ;;  %v763_v4 = vmul.u32.u64.high %v541_v62, %v540_v2, %v762_v3  ;;  %v484_v45 = vand.u32 31, %v479_v42 }
 0x10d   :  { %v551_v8 = vadd.s32 1, %v766_v6 }
 0x10e   :  { %vm550_vm8 = vc.u32 %v763_v4, %v765_v5  ;;  %v549_v22 = vadd.s32 %v765_v5, %v763_v4  ;;  %vm492_vm14 = vcmp.eq.s32.totalorder %v484_v45, 31 }
 0x10f   :  { %v552_v10 = vsel %vm550_vm8, %v551_v8, %v766_v6 }
 0x110   :  { %v553_v11 = vadd.s32 %v552_v10, %v548_v9 }
 0x112   :  { %v554_v12 = vadd.s32 536870912, %v553_v11 }
 0x114   :  { %v555_v13 = vshrl.u32 %v554_v12, 30 }
 0x116   :  { %v556_v14 = vshll.u32 %v555_v13, 30  ;;  %v579_v37 = vsub.s32 4, %v555_v13 }
 0x118   :  { %v557_v15 = vsub.s32 %v553_v11, %v556_v14  ;;  %v580_v40 = vsel %vm495_vm10, %v579_v37, %v555_v13 }
 0x119   :  { %v582_v41 = vsel %vm494_vm11, 0, %v580_v40 }
 0x11a   :  { %v559_v16 = vsub.s32 0, %v557_v15  ;;  %v586_v43 = vand.u32 3, %v582_v41 }
 0x11c   :  { %v616_v17 = vmin.u32 %v559_v16, %v557_v15  ;;  %vm591_vm12 = vcmp.eq.s32.totalorder %v586_v43, 2  ;;  %vm588_vm13 = vcmp.eq.s32.totalorder %v586_v43, 0  ;;  %vm587_vm15 = vcmp.lt.s32.totalorder %v586_v43, 2 }
 0x11e   :  { %v561_v18 = vclz %v616_v17 }
 0x120   :  { %v617_v19 = vadd.s32 4294967294, %v561_v18 }
 0x122   :  { %vm618_vm9 = vcmp.lt.s32.totalorder %v617_v19, 0 }
 0x123   :  { %v564_v20 = vsel %vm618_vm9, 0, %v617_v19 }
 0x124   :  { %v565_v23 = vsub.s32 32, %v564_v20  ;;  %v569_v24 = vsub.s32 4294967266, %v564_v20  ;;  %v566_v25 = vshll.u32 %v557_v15, %v564_v20 }
 0x126   :  { %v567_v27 = vshrl.u32 %v549_v22, %v565_v23  ;;  %v570_v28 = vadd.s32 127, %v569_v24 }
 0x128   :  { %v568_v29 = vor.u32 %v567_v27, %v566_v25  ;;  %v571_v30 = vshll.u32 %v570_v28, 23 }
 0x12a   :  { %v572_v31 = vor.u32 4788187, %v571_v30  ;;  %v575_v33 = vcvt.s32.f32 %v568_v29 }
 0x12c   :  { %v573_v32 = vand.u32 2147483647, %v572_v31 }
 0x12e   :  { %v576_v34 = vmul.f32 %v575_v33, %v573_v32 }
 0x130   :  { %v577_v35 = vxor.u32 2147483648, %v576_v34 }
 0x132   :  { %v578_v36 = vsel %vm495_vm10, %v577_v35, %v576_v34 }
 0x133   :  { %v581_v38 = vsel %vm494_vm11, %v756_v21, %v578_v36 }
 0x134   :  { %684 = vcosq.f32 %v581_v38 }
 0x135   :  { %686 = vsinq.f32 %v581_v38 }
 0x13e   :  { %v685_v44 = vpop.eup %684 }
 0x13f   :  { %v687_v46 = vpop.eup %686  ;;  %v592_v47 = vxor.u32 2147483648, %v685_v44 }
 0x140   :  { %v589_v48 = vxor.u32 2147483648, %v687_v46 }
 0x141   :  { %v593_v49 = vsel %vm591_vm12, %v592_v47, %v687_v46 }
 0x142   :  { %v590_v26 = vsel %vm588_vm13, %v685_v44, %v589_v48 }
 0x143   :  { %v594_v50 = vsel %vm587_vm15, %v590_v26, %v593_v49 }
 0x144   :  { %v595_v51 = vsel %vm585_vm0, nan, %v594_v50 }
 0x145   :  { %v598_v52 = vsel %vm492_vm14, %v756_v21, %v595_v51 }
 0x146   :  { %599 = vst [vmem:[#allocation2] sm:$0xff] %v598_v52 }
 0x147   :  { %699 = shalt.err (!%p696_p4)
}
 0x148   :  { %s700_s20 = scalar_lea.hbm %s793_s3, 128 }
 0x149   :  { %p701_p5 = scmp.ne.s32.totalorder %s793_s3, %s700_s20  ;;  %p704_p6 = scmp.lt.u32.totalorder %s700_s20, %s793_s3 }
 0x14b   :  { %p706_p7 = pnand %p704_p6, %p701_p5 }
 0x14d   :  { %709 = shalt.err (!%p706_p7)
}
 0x14e   :  { %609 = dma.vmem_to_hbm [thread:$0]  %s607_s16, 128, %s793_s3, [#allocation3]  }
 0x14f   :  { %710 = dma.done.wait [#allocation3], 128  }
 0x150   :  { %711 = vsyncadd [#allocation3], 4294967168 }
 0x151   :  { %613 = vsyncpa [#allocation3], 1 }

</bundles_post_ra>
